<compile_context>
chip_gen: v7x
topology: tpu7x:2x2x1
jax: 0.10.0
libtpu: 0.0.40
codegen_flags: <defaults>
</compile_context>

<pallas_src>
import jax
import jax.numpy as jnp
from jax.experimental import pallas as pl
from jax.experimental.pallas import tpu as pltpu

HIDDEN = 128
LANES = 128
MAX_TILE_B = 4096                    # ~8 MiB peak intermediates at this tile
VMEM_LIMIT_BYTES = 48 * 1024 * 1024  # > v5e 16 MiB default, < v7x 64 MiB phys


def mlp_kernel(x_ref, w1_ref, b1_ref, w2_ref, b2_ref, w3_ref, b3_ref, w4_ref,
               o_ref):
    # x_ref : (1, TB)        f32   batch tile, batch on lanes
    # w1_ref: (128, 1)       f32   fc1 weight column
    # b1_ref: (128, 1)       f32
    # w2_ref: (128, 128)     f32   fc2 weight, (out, in) layout
    # b2_ref: (128, 1)       f32
    # w3_ref: (128, 128)     f32   fc3 weight, (out, in) layout
    # b3_ref: (128, 1)       f32
    # w4_ref: (128, 1)       f32   fc4 weight column
    # o_ref : (1, TB)        f32
    x = x_ref[...]                                              # (1, TB)

    # fc1: K == 1 -> VPU outer-product broadcast (MXU not involved).
    h1 = jnp.maximum(w1_ref[...] * x + b1_ref[...], 0.0)        # (128, TB)

    # fc2: f32 MXU matmul, f32 accumulate, bias + ReLU.
    h2 = jnp.dot(w2_ref[...], h1, preferred_element_type=jnp.float32)
    h2 = jnp.maximum(h2 + b2_ref[...], 0.0)                     # (128, TB)

    # fc3: same pattern.
    h3 = jnp.dot(w3_ref[...], h2, preferred_element_type=jnp.float32)
    h3 = jnp.maximum(h3 + b3_ref[...], 0.0)                     # (128, TB)

    # fc4: VPU multiply + sublane (XLU) reduction -> lane-dense (1, TB) output.
    o_ref[...] = jnp.sum(h3 * w4_ref[...], axis=0, keepdims=True)


def prepare_params(params):
    """One-time layout/dtype prep, hoisted out of the forward pass."""
    return {
        "w1": params["w1"].reshape(HIDDEN, 1).astype(jnp.float32),
        "b1": params["b1"].reshape(HIDDEN, 1).astype(jnp.float32),
        "w2": params["w2"].T.astype(jnp.float32),               # (out, in)
        "b2": params["b2"].reshape(HIDDEN, 1).astype(jnp.float32),
        "w3": params["w3"].T.astype(jnp.float32),               # (out, in)
        "b3": params["b3"].reshape(HIDDEN, 1).astype(jnp.float32),
        "w4": params["w4"].reshape(HIDDEN, 1).astype(jnp.float32),
    }


def _choose_tile(batch):
    """Lane-aligned batch tile; >= 2 grid steps when the batch allows it
    (v7x megacore), capped so the working set stays well inside VMEM."""
    b_lane = ((batch + LANES - 1) // LANES) * LANES
    if b_lane <= LANES:
        return LANES
    half = ((b_lane // 2 + LANES - 1) // LANES) * LANES
    return int(min(MAX_TILE_B, half))


def mlp_forward(x, prepped):
    """x: (B, 1) float32. prepped: output of prepare_params()."""
    B = x.shape[0]
    tile_b = _choose_tile(B)
    nb = pl.cdiv(B, tile_b)
    padded_b = nb * tile_b

    # Lane-dense layout: batch on the lane (last) dimension, padded to a
    # multiple of the tile (padded rows are sliced away afterwards).
    x_row = jnp.pad(x.reshape(B).astype(jnp.float32), (0, padded_b - B))
    x_row = x_row.reshape(1, padded_b)

    const = lambda shape: pl.BlockSpec(shape, lambda i: (0, 0))

    flops = 2 * padded_b * (HIDDEN + 2 * HIDDEN * HIDDEN + HIDDEN)
    bytes_accessed = (padded_b * 4 * 2                  # x in + out
                      + 2 * HIDDEN * HIDDEN * 4         # w2, w3
                      + 5 * HIDDEN * 4)                 # w1, b1, b2, b3, w4

    out = pl.pallas_call(
        mlp_kernel,
        out_shape=jax.ShapeDtypeStruct((1, padded_b), jnp.float32),
        grid=(nb,),
        in_specs=[
            pl.BlockSpec((1, tile_b), lambda i: (0, i)),   # x tile
            const((HIDDEN, 1)),                            # w1
            const((HIDDEN, 1)),                            # b1
            const((HIDDEN, HIDDEN)),                       # w2^T
            const((HIDDEN, 1)),                            # b2
            const((HIDDEN, HIDDEN)),                       # w3^T
            const((HIDDEN, 1)),                            # b3
            const((HIDDEN, 1)),                            # w4
        ],
        out_specs=pl.BlockSpec((1, tile_b), lambda i: (0, i)),
        compiler_params=pltpu.CompilerParams(
            dimension_semantics=("parallel",),
            vmem_limit_bytes=VMEM_LIMIT_BYTES),
        cost_estimate=pl.CostEstimate(
            flops=flops, transcendentals=0, bytes_accessed=bytes_accessed),
    )(x_row, prepped["w1"], prepped["b1"], prepped["w2"], prepped["b2"],
      prepped["w3"], prepped["b3"], prepped["w4"])

    return out[0, :B].reshape(B, 1)


def init_params(key):
    """Deterministic init mimicking nn.Linear's uniform(-1/sqrt(fan_in), ...)."""
    ks = jax.random.split(key, 7)

    def uni(k, shape, fan_in):
        bound = 1.0 / jnp.sqrt(fan_in)
        return jax.random.uniform(k, shape, jnp.float32, -bound, bound)

    return {
        "w1": uni(ks[0], (1, 128), 1.0),
        "b1": uni(ks[1], (1, 128), 1.0),
        "w2": uni(ks[2], (128, 128), 128.0),
        "b2": uni(ks[3], (1, 128), 128.0),
        "w3": uni(ks[4], (128, 128), 128.0),
        "b3": uni(ks[5], (1, 128), 128.0),
        "w4": uni(ks[6], (128, 1), 128.0),
    }


def mlp_reference(x, p):
    """Pure f32 reference (matches the PyTorch module semantics)."""
    h = jnp.maximum(x @ p["w1"] + p["b1"], 0.0)
    h = jnp.maximum(h @ p["w2"] + p["b2"], 0.0)
    h = jnp.maximum(h @ p["w3"] + p["b3"], 0.0)
    return h @ p["w4"]


if __name__ == "__main__":
    key = jax.random.PRNGKey(0)
    pkey, xkey = jax.random.split(key)
    params = init_params(pkey)
    prepped = prepare_params(params)

    fwd = jax.jit(mlp_forward)

    # Small demo batch (same (B, 1) layout as the PyTorch module).
    x_small = jax.random.normal(xkey, (8, 1), dtype=jnp.float32)
    out_small = jax.block_until_ready(fwd(x_small, prepped))

    # Batch not a multiple of the lane width: exercises padding + a 2-step grid.
    x_big = jax.random.normal(jax.random.fold_in(xkey, 1), (1000, 1),
                              dtype=jnp.float32)
    out_big = jax.block_until_ready(fwd(x_big, prepped))

    for x, out in ((x_small, out_small), (x_big, out_big)):
        assert out.shape == (x.shape[0], 1)
        ref = mlp_reference(x, params)
        assert jnp.allclose(out, ref, atol=1e-3, rtol=1e-3)

    print("KERNEL_OK")
</pallas_src>

<mosaic_0001>
module attributes {stable_mosaic.version = 11 : i64} {
  func.func @mlp_kernel(%arg0: i32, %arg1: memref<1x128xf32, #tpu.memory_space<vmem>>, %arg2: memref<128x1xf32, #tpu.memory_space<vmem>>, %arg3: memref<128x1xf32, #tpu.memory_space<vmem>>, %arg4: memref<128x128xf32, #tpu.memory_space<vmem>>, %arg5: memref<128x1xf32, #tpu.memory_space<vmem>>, %arg6: memref<128x128xf32, #tpu.memory_space<vmem>>, %arg7: memref<128x1xf32, #tpu.memory_space<vmem>>, %arg8: memref<128x1xf32, #tpu.memory_space<vmem>>, %arg9: memref<1x128xf32, #tpu.memory_space<vmem>>) attributes {dimension_semantics = [#tpu.dimension_semantics<parallel>], iteration_bounds = array<i64: 1>, scalar_prefetch = 0 : i64, scratch_operands = 0 : i64, tpu.core_type = #tpu.core_type<tc>, window_params = [{transform_indices = @transform_0, window_bounds = array<i64: 1, 128>}, {pipeline_mode = #tpu.pipeline_mode<synchronous>, transform_indices = @transform_1, window_bounds = array<i64: 128, 1>}, {pipeline_mode = #tpu.pipeline_mode<synchronous>, transform_indices = @transform_2, window_bounds = array<i64: 128, 1>}, {pipeline_mode = #tpu.pipeline_mode<synchronous>, transform_indices = @transform_3, window_bounds = array<i64: 128, 128>}, {pipeline_mode = #tpu.pipeline_mode<synchronous>, transform_indices = @transform_4, window_bounds = array<i64: 128, 1>}, {pipeline_mode = #tpu.pipeline_mode<synchronous>, transform_indices = @transform_5, window_bounds = array<i64: 128, 128>}, {pipeline_mode = #tpu.pipeline_mode<synchronous>, transform_indices = @transform_6, window_bounds = array<i64: 128, 1>}, {pipeline_mode = #tpu.pipeline_mode<synchronous>, transform_indices = @transform_7, window_bounds = array<i64: 128, 1>}, {transform_indices = @transform_8, window_bounds = array<i64: 1, 128>}]} {
    %c0 = arith.constant 0 : index
    %c0_0 = arith.constant 0 : index
    %0 = vector.load %arg1[%c0, %c0_0] : memref<1x128xf32, #tpu.memory_space<vmem>>, vector<1x128xf32>
    %c0_1 = arith.constant 0 : index
    %c0_2 = arith.constant 0 : index
    %1 = vector.load %arg2[%c0_1, %c0_2] : memref<128x1xf32, #tpu.memory_space<vmem>>, vector<128x1xf32>
    %2 = vector.broadcast %1 : vector<128x1xf32> to vector<128x128xf32>
    %3 = vector.broadcast %0 : vector<1x128xf32> to vector<128x128xf32>
    %4 = arith.mulf %2, %3 : vector<128x128xf32>
    %c0_3 = arith.constant 0 : index
    %c0_4 = arith.constant 0 : index
    %5 = vector.load %arg3[%c0_3, %c0_4] : memref<128x1xf32, #tpu.memory_space<vmem>>, vector<128x1xf32>
    %6 = vector.broadcast %5 : vector<128x1xf32> to vector<128x128xf32>
    %7 = arith.addf %4, %6 : vector<128x128xf32>
    %cst = arith.constant 0.000000e+00 : f32
    %8 = vector.broadcast %cst : f32 to vector<128x128xf32>
    %9 = arith.maximumf %7, %8 : vector<128x128xf32>
    %c0_5 = arith.constant 0 : index
    %c0_6 = arith.constant 0 : index
    %10 = vector.load %arg4[%c0_5, %c0_6] : memref<128x128xf32, #tpu.memory_space<vmem>>, vector<128x128xf32>
    %cst_7 = arith.constant dense<0.000000e+00> : vector<128x128xf32>
    %11 = tpu.matmul %10, %9, %cst_7 {dimension_numbers = #tpu.dot_dimension_numbers<[1], [0], [0], [1], [0, 0, 1, 1], [], []>} : vector<128x128xf32>, vector<128x128xf32>, vector<128x128xf32> -> vector<128x128xf32>
    %c0_8 = arith.constant 0 : index
    %c0_9 = arith.constant 0 : index
    %12 = vector.load %arg5[%c0_8, %c0_9] : memref<128x1xf32, #tpu.memory_space<vmem>>, vector<128x1xf32>
    %13 = vector.broadcast %12 : vector<128x1xf32> to vector<128x128xf32>
    %14 = arith.addf %11, %13 : vector<128x128xf32>
    %cst_10 = arith.constant 0.000000e+00 : f32
    %15 = vector.broadcast %cst_10 : f32 to vector<128x128xf32>
    %16 = arith.maximumf %14, %15 : vector<128x128xf32>
    %c0_11 = arith.constant 0 : index
    %c0_12 = arith.constant 0 : index
    %17 = vector.load %arg6[%c0_11, %c0_12] : memref<128x128xf32, #tpu.memory_space<vmem>>, vector<128x128xf32>
    %cst_13 = arith.constant dense<0.000000e+00> : vector<128x128xf32>
    %18 = tpu.matmul %17, %16, %cst_13 {dimension_numbers = #tpu.dot_dimension_numbers<[1], [0], [0], [1], [0, 0, 1, 1], [], []>} : vector<128x128xf32>, vector<128x128xf32>, vector<128x128xf32> -> vector<128x128xf32>
    %c0_14 = arith.constant 0 : index
    %c0_15 = arith.constant 0 : index
    %19 = vector.load %arg7[%c0_14, %c0_15] : memref<128x1xf32, #tpu.memory_space<vmem>>, vector<128x1xf32>
    %20 = vector.broadcast %19 : vector<128x1xf32> to vector<128x128xf32>
    %21 = arith.addf %18, %20 : vector<128x128xf32>
    %cst_16 = arith.constant 0.000000e+00 : f32
    %22 = vector.broadcast %cst_16 : f32 to vector<128x128xf32>
    %23 = arith.maximumf %21, %22 : vector<128x128xf32>
    %c0_17 = arith.constant 0 : index
    %c0_18 = arith.constant 0 : index
    %24 = vector.load %arg8[%c0_17, %c0_18] : memref<128x1xf32, #tpu.memory_space<vmem>>, vector<128x1xf32>
    %25 = vector.broadcast %24 : vector<128x1xf32> to vector<128x128xf32>
    %26 = arith.mulf %23, %25 : vector<128x128xf32>
    %cst_19 = arith.constant dense<0.000000e+00> : vector<128xf32>
    %27 = vector.multi_reduction <add>, %26, %cst_19 [0] : vector<128x128xf32> to vector<128xf32>
    %28 = vector.shape_cast %27 : vector<128xf32> to vector<1x128xf32>
    %c0_20 = arith.constant 0 : index
    %c0_21 = arith.constant 0 : index
    %29 = vector.load %arg9[%c0_20, %c0_21] : memref<1x128xf32, #tpu.memory_space<vmem>>, vector<1x128xf32>
    tpu.vector_store %arg9[%c0_20, %c0_21], %28 {strides = array<i32>} : memref<1x128xf32, #tpu.memory_space<vmem>>, vector<1x128xf32>,
    return
  }
  func.func @transform_0(%arg0: i32) -> (i32, i32) {
    %c0_i32 = arith.constant 0 : i32
    %c0_i32_0 = arith.constant 0 : i32
    return %c0_i32, %arg0 : i32, i32
  }
  func.func @transform_1(%arg0: i32) -> (i32, i32) {
    %c0_i32 = arith.constant 0 : i32
    %c0_i32_0 = arith.constant 0 : i32
    %c0_i32_1 = arith.constant 0 : i32
    return %c0_i32, %c0_i32_0 : i32, i32
  }
  func.func @transform_2(%arg0: i32) -> (i32, i32) {
    %c0_i32 = arith.constant 0 : i32
    %c0_i32_0 = arith.constant 0 : i32
    %c0_i32_1 = arith.constant 0 : i32
    return %c0_i32, %c0_i32_0 : i32, i32
  }
  func.func @transform_3(%arg0: i32) -> (i32, i32) {
    %c0_i32 = arith.constant 0 : i32
    %c0_i32_0 = arith.constant 0 : i32
    %c0_i32_1 = arith.constant 0 : i32
    return %c0_i32, %c0_i32_0 : i32, i32
  }
  func.func @transform_4(%arg0: i32) -> (i32, i32) {
    %c0_i32 = arith.constant 0 : i32
    %c0_i32_0 = arith.constant 0 : i32
    %c0_i32_1 = arith.constant 0 : i32
    return %c0_i32, %c0_i32_0 : i32, i32
  }
  func.func @transform_5(%arg0: i32) -> (i32, i32) {
    %c0_i32 = arith.constant 0 : i32
    %c0_i32_0 = arith.constant 0 : i32
    %c0_i32_1 = arith.constant 0 : i32
    return %c0_i32, %c0_i32_0 : i32, i32
  }
  func.func @transform_6(%arg0: i32) -> (i32, i32) {
    %c0_i32 = arith.constant 0 : i32
    %c0_i32_0 = arith.constant 0 : i32
    %c0_i32_1 = arith.constant 0 : i32
    return %c0_i32, %c0_i32_0 : i32, i32
  }
  func.func @transform_7(%arg0: i32) -> (i32, i32) {
    %c0_i32 = arith.constant 0 : i32
    %c0_i32_0 = arith.constant 0 : i32
    %c0_i32_1 = arith.constant 0 : i32
    return %c0_i32, %c0_i32_0 : i32, i32
  }
  func.func @transform_8(%arg0: i32) -> (i32, i32) {
    %c0_i32 = arith.constant 0 : i32
    %c0_i32_0 = arith.constant 0 : i32
    return %c0_i32, %arg0 : i32, i32
  }
}

</mosaic_0001>

<bundles_post_ra>
// kernel: mlp_forward.1
= control target key start
LH: loop header
LB: loop body
LE: loop exit
PB: predicated region body
PF: predicated region fallthrough
CT: control target
= control target key end

     0   :  { %v1204_v0 = vmov 0   ;;  %s1610_s2 = inlined_call_operand.vmem [shape: f32[128,1], index: 2, kind: input, shape index: {}]   ;;  %s1611_s1 = inlined_call_operand.vmem [shape: f32[128,1], index: 1, kind: input, shape index: {}]   ;;  %s1612_s4 = inlined_call_operand.vmem [shape: f32[128,1], index: 4, kind: input, shape index: {}]   ;;  %s1613_s3 = inlined_call_operand.vmem [shape: f32[128,128], index: 3, kind: input, shape index: {}]   ;;  %s1614_s6 = inlined_call_operand.vmem [shape: f32[128,1], index: 6, kind: input, shape index: {}]   ;;  %s1615_s7 = inlined_call_operand.vmem [shape: f32[128,1], index: 7, kind: input, shape index: {}]   ;;  %s1616_s0 = inlined_call_operand.vmem [shape: f32[1,128], index: 0, kind: input, shape index: {}]   ;;  %s1617_s5 = inlined_call_operand.vmem [shape: f32[128,128], index: 5, kind: input, shape index: {}]   ;;  %s1618_s8 = inlined_call_operand.vmem [shape: f32[1,128], index: 8, kind: output, shape index: {}]  }
   0x1   :  { %1203 = vset.pattern.permute.xlu1 %v1204_v0  ;;  %1202 = vset.pattern.permute.xlu0 %v1204_v0  ;;  %v148_v1 = vld [vmem:[%s1610_s2] sm:$0xff]  ;;  %v149_v3 = vld [vmem:[%s1610_s2 + $0x8] sm:$0xff]  ;;  %v33_v5 = vld [vmem:[%s1611_s1 + $0x18] sm:$0xff] }
   0x2   :  { %v30_v2 = vld [vmem:[%s1611_s1] sm:$0xff]  ;;  %166 = vperm.xlu1 %1203, %v148_v1   ;;  %v31_v4 = vld [vmem:[%s1611_s1 + $0x8] sm:$0xff]  ;;  %v32_v6 = vld [vmem:[%s1611_s1 + $0x10] sm:$0xff] }
   0x3   :  { %48 = vperm.xlu0 %1202, %v30_v2   ;;  %v151_v7 = vld [vmem:[%s1610_s2 + $0x18] sm:$0xff]  ;;  %v150_v8 = vld [vmem:[%s1610_s2 + $0x10] sm:$0xff]  ;;  %v35_v9 = vld [vmem:[%s1611_s1 + $0x28] sm:$0xff] }
   0x4   :  { %v34_v10 = vld [vmem:[%s1611_s1 + $0x20] sm:$0xff]  ;;  %v153_v11 = vld [vmem:[%s1610_s2 + $0x28] sm:$0xff]  ;;  %v37_v13 = vld [vmem:[%s1611_s1 + $0x38] sm:$0xff] }
   0x5   :  { %v152_v12 = vld [vmem:[%s1610_s2 + $0x20] sm:$0xff]  ;;  %v36_v14 = vld [vmem:[%s1611_s1 + $0x30] sm:$0xff]  ;;  %v155_v15 = vld [vmem:[%s1610_s2 + $0x38] sm:$0xff] }
   0x6   :  { %171 = vperm.xlu1 %1203, %v149_v3   ;;  %v154_v16 = vld [vmem:[%s1610_s2 + $0x30] sm:$0xff]  ;;  %v39_v17 = vld [vmem:[%s1611_s1 + $0x48] sm:$0xff]  ;;  %v38_v18 = vld [vmem:[%s1611_s1 + $0x40] sm:$0xff] }
   0x7   :  { %53 = vperm.xlu0 %1202, %v31_v4   ;;  %v157_v19 = vld [vmem:[%s1610_s2 + $0x48] sm:$0xff]  ;;  %v156_v20 = vld [vmem:[%s1610_s2 + $0x40] sm:$0xff]  ;;  %v41_v21 = vld [vmem:[%s1611_s1 + $0x58] sm:$0xff] }
   0x8   :  { %v40_v22 = vld [vmem:[%s1611_s1 + $0x50] sm:$0xff]  ;;  %v159_v23 = vld [vmem:[%s1610_s2 + $0x58] sm:$0xff]  ;;  %v43_v25 = vld [vmem:[%s1611_s1 + $0x68] sm:$0xff] }
   0x9   :  { %v158_v24 = vld [vmem:[%s1610_s2 + $0x50] sm:$0xff]  ;;  %v42_v26 = vld [vmem:[%s1611_s1 + $0x60] sm:$0xff]  ;;  %v161_v27 = vld [vmem:[%s1610_s2 + $0x68] sm:$0xff] }
   0xa   :  { %63 = vperm.xlu1 %1203, %v33_v5   ;;  %v160_v28 = vld [vmem:[%s1610_s2 + $0x60] sm:$0xff]  ;;  %v45_v29 = vld [vmem:[%s1611_s1 + $0x78] sm:$0xff]  ;;  %v44_v30 = vld [vmem:[%s1611_s1 + $0x70] sm:$0xff] }
   0xb   :  { %58 = vperm.xlu0 %1202, %v32_v6   ;;  %v163_v31 = vld [vmem:[%s1610_s2 + $0x78] sm:$0xff]  ;;  %v162_v32 = vld [vmem:[%s1610_s2 + $0x70] sm:$0xff]  ;;  %v293_v33 = vld [vmem:[%s1612_s4 + $0x8] sm:$0xff] }
   0xc   :  { %v292_v34 = vld [vmem:[%s1612_s4] sm:$0xff]  ;;  %v295_v35 = vld [vmem:[%s1612_s4 + $0x18] sm:$0xff]  ;;  %v294_v36 = vld [vmem:[%s1612_s4 + $0x10] sm:$0xff] }
   0xd   :  { %v276_v37 = vld [vmem:[%s1613_s3] sm:$0xff]  ;;  %v297_v38 = vld [vmem:[%s1612_s4 + $0x28] sm:$0xff]  ;;  %v299_v40 = vld [vmem:[%s1612_s4 + $0x38] sm:$0xff] }
   0xe   :  { %181 = vperm.xlu1 %1203, %v151_v7   ;;  %v296_v39 = vld [vmem:[%s1612_s4 + $0x20] sm:$0xff]  ;;  %1057 = vmatprep.mubr.f32.mxu0 %v276_v37  ;;  %v298_v41 = vld [vmem:[%s1612_s4 + $0x30] sm:$0xff]  ;;  %v301_v42 = vld [vmem:[%s1612_s4 + $0x48] sm:$0xff] }
   0xf   :  { %176 = vperm.xlu0 %1202, %v150_v8   ;;  %v300_v43 = vld [vmem:[%s1612_s4 + $0x40] sm:$0xff]  ;;  %v303_v44 = vld [vmem:[%s1612_s4 + $0x58] sm:$0xff]  ;;  %v302_v45 = vld [vmem:[%s1612_s4 + $0x50] sm:$0xff] }
  0x10   :  { %v305_v46 = vld [vmem:[%s1612_s4 + $0x68] sm:$0xff]  ;;  %v304_v47 = vld [vmem:[%s1612_s4 + $0x60] sm:$0xff]  ;;  %v307_v48 = vld [vmem:[%s1612_s4 + $0x78] sm:$0xff] }
  0x11   :  { %v306_v49 = vld [vmem:[%s1612_s4 + $0x70] sm:$0xff]  ;;  %v566_v50 = vld [vmem:[%s1614_s6 + $0x8] sm:$0xff]  ;;  %v565_v51 = vld [vmem:[%s1614_s6] sm:$0xff] }
  0x12   :  { %73 = vperm.xlu1 %1203, %v35_v9   ;;  %v568_v52 = vld [vmem:[%s1614_s6 + $0x18] sm:$0xff]  ;;  %v567_v53 = vld [vmem:[%s1614_s6 + $0x10] sm:$0xff]  ;;  %v822_v54 = vld [vmem:[%s1615_s7] sm:$0xff] }
  0x13   :  { %68 = vperm.xlu0 %1202, %v34_v10   ;;  %v569_v55 = vld [vmem:[%s1614_s6 + $0x20] sm:$0xff]  ;;  %v824_v56 = vld [vmem:[%s1615_s7 + $0x10] sm:$0xff]  ;;  %v823_v57 = vld [vmem:[%s1615_s7 + $0x8] sm:$0xff] }
  0x14   :  { %v825_v58 = vld [vmem:[%s1615_s7 + $0x18] sm:$0xff]  ;;  %v570_v59 = vld [vmem:[%s1614_s6 + $0x28] sm:$0xff]  ;;  %v826_v60 = vld [vmem:[%s1615_s7 + $0x20] sm:$0xff] }
  0x15   :  { %v571_v61 = vld [vmem:[%s1614_s6 + $0x30] sm:$0xff]  ;;  %v827_v62 = vld [vmem:[%s1615_s7 + $0x28] sm:$0xff]  ;;  %v572_v63 = vld [vmem:[%s1614_s6 + $0x38] sm:$0xff] }
  0x16   :  { %191 = vperm.xlu1 %1203, %v153_v11   ;;  %v828_v0 = vld [vmem:[%s1615_s7 + $0x30] sm:$0xff]  ;;  %v573_v1 = vld [vmem:[%s1614_s6 + $0x40] sm:$0xff]  ;;  %v829_v3 = vld [vmem:[%s1615_s7 + $0x38] sm:$0xff] }
  0x17   :  { %186 = vperm.xlu0 %1202, %v152_v12   ;;  %v1448_v2 = vld [vmem:[%s1616_s0] ss:$0 sm:$0xff]  ;;  %v574_v4 = vld [vmem:[%s1614_s6 + $0x48] sm:$0xff]  ;;  %v575_v9 = vld [vmem:[%s1614_s6 + $0x50] sm:$0xff] }
  0x18   :  { %v830_v8 = vld [vmem:[%s1615_s7 + $0x40] sm:$0xff] }
  0x19   :  { %v834_v37 = vld [vmem:[%s1615_s7 + $0x60] sm:$0xff] }
  0x1a   :  { %83 = vperm.xlu1 %1203, %v37_v13  }
  0x1b   :  { %78 = vperm.xlu0 %1202, %v36_v14   ;;  %v831_v14 = vld [vmem:[%s1615_s7 + $0x48] sm:$0xff] }
  0x1e   :  { %201 = vperm.xlu1 %1203, %v155_v15   ;;  %v576_v15 = vld [vmem:[%s1614_s6 + $0x58] sm:$0xff] }
  0x1f   :  { %196 = vperm.xlu0 %1202, %v154_v16  }
  0x22   :  { %93 = vperm.xlu1 %1203, %v39_v17  }
  0x23   :  { %88 = vperm.xlu0 %1202, %v38_v18  }
  0x26   :  { %211 = vperm.xlu1 %1203, %v157_v19  }
  0x27   :  { %206 = vperm.xlu0 %1202, %v156_v20  }
  0x2a   :  { %103 = vperm.xlu1 %1203, %v41_v21   ;;  %v832_v21 = vld [vmem:[%s1615_s7 + $0x50] sm:$0xff] }
  0x2b   :  { %98 = vperm.xlu0 %1202, %v40_v22   ;;  %v577_v22 = vld [vmem:[%s1614_s6 + $0x60] sm:$0xff] }
  0x2e   :  { %221 = vperm.xlu1 %1203, %v159_v23  }
  0x2f   :  { %216 = vperm.xlu0 %1202, %v158_v24  }
  0x32   :  { %113 = vperm.xlu1 %1203, %v43_v25  }
  0x33   :  { %108 = vperm.xlu0 %1202, %v42_v26  }
  0x36   :  { %231 = vperm.xlu1 %1203, %v161_v27  }
  0x37   :  { %226 = vperm.xlu0 %1202, %v160_v28  }
  0x3a   :  { %123 = vperm.xlu1 %1203, %v45_v29  }
  0x3b   :  { %118 = vperm.xlu0 %1202, %v44_v30   ;;  %v833_v30 = vld [vmem:[%s1615_s7 + $0x58] sm:$0xff] }
  0x3e   :  { %241 = vperm.xlu1 %1203, %v163_v31   ;;  %v578_v31 = vld [vmem:[%s1614_s6 + $0x68] sm:$0xff] }
  0x3f   :  { %236 = vperm.xlu0 %1202, %v162_v32  }
  0x42   :  { %315 = vperm.xlu1 %1203, %v293_v33  }
  0x43   :  { %310 = vperm.xlu0 %1202, %v292_v34  }
  0x46   :  { %325 = vperm.xlu1 %1203, %v295_v35  }
  0x47   :  { %320 = vperm.xlu0 %1202, %v294_v36  }
  0x4a   :  { %335 = vperm.xlu1 %1203, %v297_v38   ;;  %v579_v38 = vld [vmem:[%s1614_s6 + $0x70] sm:$0xff] }
  0x4b   :  { %330 = vperm.xlu0 %1202, %v296_v39  }
  0x4e   :  { %345 = vperm.xlu1 %1203, %v299_v40  }
  0x4f   :  { %340 = vperm.xlu0 %1202, %v298_v41  }
  0x52   :  { %355 = vperm.xlu1 %1203, %v301_v42  }
  0x53   :  { %350 = vperm.xlu0 %1202, %v300_v43  }
  0x56   :  { %365 = vperm.xlu1 %1203, %v303_v44  }
  0x57   :  { %360 = vperm.xlu0 %1202, %v302_v45   ;;  %v835_v45 = vld [vmem:[%s1615_s7 + $0x68] sm:$0xff] }
  0x5a   :  { %375 = vperm.xlu1 %1203, %v305_v46   ;;  %v580_v46 = vld [vmem:[%s1614_s6 + $0x78] sm:$0xff] }
  0x5b   :  { %370 = vperm.xlu0 %1202, %v304_v47  }
  0x5e   :  { %385 = vperm.xlu1 %1203, %v307_v48  }
  0x5f   :  { %380 = vperm.xlu0 %1202, %v306_v49  }
  0x62   :  { %588 = vperm.xlu1 %1203, %v566_v50  }
  0x63   :  { %583 = vperm.xlu0 %1202, %v565_v51  }
  0x66   :  { %598 = vperm.xlu1 %1203, %v568_v52   ;;  %v837_v52 = vld [vmem:[%s1615_s7 + $0x78] sm:$0xff] }
  0x67   :  { %593 = vperm.xlu0 %1202, %v567_v53   ;;  %v836_v53 = vld [vmem:[%s1615_s7 + $0x70] sm:$0xff] }
  0x6a   :  { %840 = vperm.xlu1 %1203, %v822_v54  }
  0x6b   :  { %603 = vperm.xlu0 %1202, %v569_v55  }
  0x6e   :  { %850 = vperm.xlu1 %1203, %v824_v56  }
  0x6f   :  { %845 = vperm.xlu0 %1202, %v823_v57  }
  0x72   :  { %855 = vperm.xlu1 %1203, %v825_v58  }
  0x73   :  { %608 = vperm.xlu0 %1202, %v570_v59  }
  0x76   :  { %860 = vperm.xlu1 %1203, %v826_v60  }
  0x77   :  { %613 = vperm.xlu0 %1202, %v571_v61  }
  0x7a   :  { %865 = vperm.xlu1 %1203, %v827_v62  }
  0x7b   :  { %618 = vperm.xlu0 %1202, %v572_v63  }
  0x7e   :  { %870 = vperm.xlu1 %1203, %v828_v0  }
  0x7f   :  { %623 = vperm.xlu0 %1202, %v573_v1  }
  0x81   :  { %v167_v5 = vpop.permute.xlu1 %166 }
  0x82   :  { %v49_v6 = vpop.permute.xlu0 %48  ;;  %875 = vperm.xlu1 %1203, %v829_v3  }
  0x83   :  { %v132_v7 = vmul.f32 %v1448_v2, %v49_v6  ;;  %628 = vperm.xlu0 %1202, %v574_v4  }
  0x85   :  { %v172_v10 = vpop.permute.xlu1 %171  ;;  %v244_v12 = vadd.f32 %v167_v5, %v132_v7 }
  0x86   :  { %v54_v11 = vpop.permute.xlu0 %53  ;;  %880 = vperm.xlu1 %1203, %v830_v8  }
  0x87   :  { %v133_v13 = vmul.f32 %v1448_v2, %v54_v11  ;;  %633 = vperm.xlu0 %1202, %v575_v9   ;;  %v260_v19 = vmax.f32 %v244_v12, 0.0 }
  0x89   :  { %v245_v16 = vadd.f32 %v172_v10, %v133_v13  ;;  %v64_v17 = vpop.permute.xlu1 %63 }
  0x8a   :  { %v59_v18 = vpop.permute.xlu0 %58  ;;  %885 = vperm.xlu1 %1203, %v831_v14   ;;  %v135_v23 = vmul.f32 %v1448_v2, %v64_v17 }
  0x8b   :  { %v261_v20 = vmax.f32 %v245_v16, 0.0  ;;  %638 = vperm.xlu0 %1202, %v576_v15   ;;  %v134_v24 = vmul.f32 %v1448_v2, %v59_v18 }
  0x8d   :  { %v1137_v25 = vpack.c.bf16 %v261_v20, %v260_v19  ;;  %v182_v26 = vpop.permute.xlu1 %181 }
  0x8e   :  { %v177_v27 = vpop.permute.xlu0 %176  ;;  %v247_v28 = vadd.f32 %v182_v26, %v135_v23  ;;  %890 = vperm.xlu1 %1203, %v832_v21  }
  0x8f   :  { %v246_v29 = vadd.f32 %v177_v27, %v134_v24  ;;  %643 = vperm.xlu0 %1202, %v577_v22   ;;  %1138 = vmatprep.subr.bf16.mxu0 %v1137_v25 }
  0x90   :  { %v263_v32 = vmax.f32 %v247_v28, 0.0  ;;  %1140 = vmatpush3.bf16.msra.mxu0 %v1137_v25 }
  0x91   :  { %v262_v33 = vmax.f32 %v246_v29, 0.0  ;;  %v74_v34 = vpop.permute.xlu1 %73 }
  0x92   :  { %v69_v35 = vpop.permute.xlu0 %68  ;;  %895 = vperm.xlu1 %1203, %v833_v30   ;;  %v137_v39 = vmul.f32 %v1448_v2, %v74_v34 }
  0x93   :  { %v1141_v36 = vpack.c.bf16 %v263_v32, %v262_v33  ;;  %648 = vperm.xlu0 %1202, %v578_v31   ;;  %v136_v40 = vmul.f32 %v1448_v2, %v69_v35 }
  0x95   :  { %1142 = vmatprep.subr.bf16.mxu0 %v1141_v36  ;;  %v192_v41 = vpop.permute.xlu1 %191 }
  0x96   :  { %v187_v42 = vpop.permute.xlu0 %186  ;;  %1144 = vmatpush3.bf16.msra.mxu0 %v1141_v36  ;;  %v249_v43 = vadd.f32 %v192_v41, %v137_v39  ;;  %900 = vperm.xlu1 %1203, %v834_v37  }
  0x97   :  { %v248_v44 = vadd.f32 %v187_v42, %v136_v40  ;;  %653 = vperm.xlu0 %1202, %v579_v38  }
  0x98   :  { %v265_v47 = vmax.f32 %v249_v43, 0.0 }
  0x99   :  { %v264_v48 = vmax.f32 %v248_v44, 0.0  ;;  %v84_v49 = vpop.permute.xlu1 %83  ;;  %v277_v44 = vld [vmem:[%s1613_s3 + $0x8] sm:$0xff] }
  0x9a   :  { %v79_v50 = vpop.permute.xlu0 %78  ;;  %905 = vperm.xlu1 %1203, %v835_v45   ;;  %v139_v54 = vmul.f32 %v1448_v2, %v84_v49  ;;  %v278_v45 = vld [vmem:[%s1613_s3 + $0x10] sm:$0xff]  ;;  %v283_v49 = vld [vmem:[%s1613_s3 + $0x38] sm:$0xff] }
  0x9b   :  { %v1145_v51 = vpack.c.bf16 %v265_v47, %v264_v48  ;;  %658 = vperm.xlu0 %1202, %v580_v46   ;;  %v138_v55 = vmul.f32 %v1448_v2, %v79_v50  ;;  %v280_v46 = vld [vmem:[%s1613_s3 + $0x20] sm:$0xff]  ;;  %v281_v47 = vld [vmem:[%s1613_s3 + $0x28] sm:$0xff]  ;;  %v282_v48 = vld [vmem:[%s1613_s3 + $0x30] sm:$0xff] }
  0x9c   :  { %v284_v50 = vld [vmem:[%s1613_s3 + $0x40] sm:$0xff] }
  0x9d   :  { %1146 = vmatprep.subr.bf16.mxu0 %v1145_v51  ;;  %v202_v56 = vpop.permute.xlu1 %201 }
  0x9e   :  { %v197_v57 = vpop.permute.xlu0 %196  ;;  %1148 = vmatpush3.bf16.msra.mxu0 %v1145_v51  ;;  %v251_v58 = vadd.f32 %v202_v56, %v139_v54  ;;  %915 = vperm.xlu1 %1203, %v837_v52   ;;  %v285_v51 = vld [vmem:[%s1613_s3 + $0x48] sm:$0xff]  ;;  %v286_v52 = vld [vmem:[%s1613_s3 + $0x50] sm:$0xff]  ;;  %v288_v54 = vld [vmem:[%s1613_s3 + $0x60] sm:$0xff] }
  0x9f   :  { %v250_v59 = vadd.f32 %v197_v57, %v138_v55  ;;  %910 = vperm.xlu0 %1202, %v836_v53   ;;  %v287_v53 = vld [vmem:[%s1613_s3 + $0x58] sm:$0xff]  ;;  %v289_v55 = vld [vmem:[%s1613_s3 + $0x68] sm:$0xff]  ;;  %v290_v56 = vld [vmem:[%s1613_s3 + $0x70] sm:$0xff] }
  0xa0   :  { %v267_v60 = vmax.f32 %v251_v58, 0.0  ;;  %v291_v57 = vld [vmem:[%s1613_s3 + $0x78] sm:$0xff]  ;;  %v549_v58 = vld [vmem:[%s1617_s5] sm:$0xff] }
  0xa1   :  { %v266_v61 = vmax.f32 %v250_v59, 0.0  ;;  %v94_v62 = vpop.permute.xlu1 %93  ;;  %1113 = vmatprep.mubr.f32.mxu1 %v549_v58 }
  0xa2   :  { %v89_v63 = vpop.permute.xlu0 %88  ;;  %v141_v1 = vmul.f32 %v1448_v2, %v94_v62 }
  0xa3   :  { %v1149_v0 = vpack.c.bf16 %v267_v60, %v266_v61  ;;  %v140_v3 = vmul.f32 %v1448_v2, %v89_v63 }
  0xa5   :  { %1150 = vmatprep.subr.bf16.mxu0 %v1149_v0  ;;  %v212_v4 = vpop.permute.xlu1 %211 }
  0xa6   :  { %v207_v5 = vpop.permute.xlu0 %206  ;;  %1152 = vmatpush3.bf16.msra.mxu0 %v1149_v0  ;;  %v253_v6 = vadd.f32 %v212_v4, %v141_v1 }
  0xa7   :  { %v252_v7 = vadd.f32 %v207_v5, %v140_v3 }
  0xa8   :  { %v269_v8 = vmax.f32 %v253_v6, 0.0 }
  0xa9   :  { %v268_v9 = vmax.f32 %v252_v7, 0.0  ;;  %v104_v10 = vpop.permute.xlu1 %103 }
  0xaa   :  { %v99_v11 = vpop.permute.xlu0 %98  ;;  %v143_v13 = vmul.f32 %v1448_v2, %v104_v10 }
  0xab   :  { %v1153_v12 = vpack.c.bf16 %v269_v8, %v268_v9  ;;  %v142_v14 = vmul.f32 %v1448_v2, %v99_v11 }
  0xad   :  { %1154 = vmatprep.subr.bf16.mxu0 %v1153_v12  ;;  %v222_v15 = vpop.permute.xlu1 %221 }
  0xae   :  { %v217_v16 = vpop.permute.xlu0 %216  ;;  %1156 = vmatpush3.bf16.msra.mxu0 %v1153_v12  ;;  %v255_v17 = vadd.f32 %v222_v15, %v143_v13 }
  0xaf   :  { %v254_v18 = vadd.f32 %v217_v16, %v142_v14 }
  0xb0   :  { %v271_v19 = vmax.f32 %v255_v17, 0.0 }
  0xb1   :  { %v270_v20 = vmax.f32 %v254_v18, 0.0  ;;  %v114_v21 = vpop.permute.xlu1 %113 }
  0xb2   :  { %v109_v22 = vpop.permute.xlu0 %108  ;;  %v145_v24 = vmul.f32 %v1448_v2, %v114_v21 }
  0xb3   :  { %v1157_v23 = vpack.c.bf16 %v271_v19, %v270_v20  ;;  %v144_v25 = vmul.f32 %v1448_v2, %v109_v22 }
  0xb5   :  { %1158 = vmatprep.subr.bf16.mxu0 %v1157_v23  ;;  %v232_v26 = vpop.permute.xlu1 %231 }
  0xb6   :  { %v227_v27 = vpop.permute.xlu0 %226  ;;  %1160 = vmatpush3.bf16.msra.mxu0 %v1157_v23  ;;  %v257_v28 = vadd.f32 %v232_v26, %v145_v24 }
  0xb7   :  { %v256_v29 = vadd.f32 %v227_v27, %v144_v25 }
  0xb8   :  { %v273_v30 = vmax.f32 %v257_v28, 0.0 }
  0xb9   :  { %v272_v31 = vmax.f32 %v256_v29, 0.0  ;;  %v124_v32 = vpop.permute.xlu1 %123 }
  0xba   :  { %v119_v33 = vpop.permute.xlu0 %118  ;;  %v147_v35 = vmul.f32 %v1448_v2, %v124_v32 }
  0xbb   :  { %v1161_v34 = vpack.c.bf16 %v273_v30, %v272_v31  ;;  %v146_v36 = vmul.f32 %v1448_v2, %v119_v33  ;;  %v279_v2 = vld [vmem:[%s1613_s3 + $0x18] sm:$0xff] }
  0xbd   :  { %1162 = vmatprep.subr.bf16.mxu0 %v1161_v34  ;;  %v242_v37 = vpop.permute.xlu1 %241 }
  0xbe   :  { %v237_v38 = vpop.permute.xlu0 %236  ;;  %1164 = vmatpush3.bf16.msra.mxu0 %v1161_v34  ;;  %v259_v39 = vadd.f32 %v242_v37, %v147_v35 }
  0xbf   :  { %v258_v40 = vadd.f32 %v237_v38, %v146_v36 }
  0xc0   :  { %v275_v41 = vmax.f32 %v259_v39, 0.0 }
  0xc1   :  { %v274_v42 = vmax.f32 %v258_v40, 0.0  ;;  %v316_v59 = vpop.permute.xlu1 %315 }
  0xc2   :  { %v311_v60 = vpop.permute.xlu0 %310 }
  0xc3   :  { %v1165_v43 = vpack.c.bf16 %v275_v41, %v274_v42 }
  0xc5   :  { %1166 = vmatprep.subr.bf16.mxu0 %v1165_v43  ;;  %v326_v61 = vpop.permute.xlu1 %325 }
  0xc6   :  { %1168 = vmatpush3.bf16.msra.mxu0 %v1165_v43  ;;  %v321_v62 = vpop.permute.xlu0 %320 }
  0xc9   :  { %1058 = vmatmul.mubr.f32.vlgmr.msra.gmra.mrb[0].mxu0 %v277_v44  ;;  %v336_v63 = vpop.permute.xlu1 %335 }
  0xca   :  { %1060 = vmatprep.mubr.f32.mxu0 %v278_v45  ;;  %v331_v0 = vpop.permute.xlu0 %330 }
  0xcd   :  { %1061 = vmatmul.mubr.f32.gmra.mrb[2].mxu0 %v279_v2  ;;  %v346_v7 = vpop.permute.xlu1 %345 }
  0xce   :  { %1063 = vmatprep.mubr.f32.mxu0 %v280_v46  ;;  %v341_v10 = vpop.permute.xlu0 %340 }
  0xd1   :  { %1064 = vmatmul.mubr.f32.gmra.mrb[4].mxu0 %v281_v47  ;;  %v356_v20 = vpop.permute.xlu1 %355 }
  0xd2   :  { %1066 = vmatprep.mubr.f32.mxu0 %v282_v48  ;;  %v351_v23 = vpop.permute.xlu0 %350 }
  0xd5   :  { %1067 = vmatmul.mubr.f32.gmra.mrb[6].mxu0 %v283_v49  ;;  %v366_v32 = vpop.permute.xlu1 %365 }
  0xd6   :  { %1069 = vmatprep.mubr.f32.mxu0 %v284_v50  ;;  %v361_v35 = vpop.permute.xlu0 %360 }
  0xd9   :  { %1070 = vmatmul.mubr.f32.gmra.mrb[8].mxu0 %v285_v51  ;;  %v376_v45 = vpop.permute.xlu1 %375 }
  0xda   :  { %1072 = vmatprep.mubr.f32.mxu0 %v286_v52  ;;  %v371_v47 = vpop.permute.xlu0 %370 }
  0xdd   :  { %1073 = vmatmul.mubr.f32.gmra.mrb[10].mxu0 %v287_v53 }
  0xde   :  { %1075 = vmatprep.mubr.f32.mxu0 %v288_v54 }
  0xe1   :  { %1076 = vmatmul.mubr.f32.gmra.mrb[12].mxu0 %v289_v55 }
  0xe2   :  { %1078 = vmatprep.mubr.f32.mxu0 %v290_v56  ;;  %v386_v56 = vpop.permute.xlu1 %385 }
  0xe5   :  { %1079 = vmatmul.mubr.f32.gmra.mrb[14].mxu0 %v291_v57 }
 0x19c   :  { %v1059_v1 = vpop.f32.mrb[0].mxu0 }
 0x19d   :  { %v460_v3 = vadd.f32 %v1059_v1, %v316_v59  ;;  %v454_v4 = vpop.f32.mrb[1].mxu0  ;;  %v381_v59 = vpop.permute.xlu0 %380 }
 0x19e   :  { %v455_v5 = vadd.f32 %v454_v4, %v311_v60  ;;  %v550_v4 = vld [vmem:[%s1617_s5 + $0x8] sm:$0xff] }
 0x19f   :  { %v534_v6 = vmax.f32 %v460_v3, 0.0 }
 0x1a0   :  { %v533_v8 = vmax.f32 %v455_v5, 0.0  ;;  %v1062_v9 = vpop.f32.mrb[2].mxu0  ;;  %v551_v5 = vld [vmem:[%s1617_s5 + $0x10] sm:$0xff] }
 0x1a1   :  { %v470_v11 = vadd.f32 %v1062_v9, %v326_v61  ;;  %v464_v12 = vpop.f32.mrb[3].mxu0  ;;  %v555_v9 = vld [vmem:[%s1617_s5 + $0x30] sm:$0xff] }
 0x1a2   :  { %v465_v13 = vadd.f32 %v464_v12, %v321_v62  ;;  %v1169_v14 = vpack.c.bf16 %v534_v6, %v533_v8  ;;  %v552_v6 = vld [vmem:[%s1617_s5 + $0x18] sm:$0xff]  ;;  %v554_v8 = vld [vmem:[%s1617_s5 + $0x28] sm:$0xff] }
 0x1a3   :  { %v536_v15 = vmax.f32 %v470_v11, 0.0  ;;  %v557_v11 = vld [vmem:[%s1617_s5 + $0x40] sm:$0xff]  ;;  %v558_v12 = vld [vmem:[%s1617_s5 + $0x48] sm:$0xff] }
 0x1a4   :  { %v535_v16 = vmax.f32 %v465_v13, 0.0  ;;  %v1065_v17 = vpop.f32.mrb[4].mxu0  ;;  %1170 = vmatprep.subr.bf16.mxu1 %v1169_v14  ;;  %v559_v13 = vld [vmem:[%s1617_s5 + $0x50] sm:$0xff] }
 0x1a5   :  { %v480_v18 = vadd.f32 %v1065_v17, %v336_v63  ;;  %v474_v19 = vpop.f32.mrb[5].mxu0  ;;  %1172 = vmatpush3.bf16.msra.mxu1 %v1169_v14  ;;  %v560_v14 = vld [vmem:[%s1617_s5 + $0x58] sm:$0xff]  ;;  %v563_v17 = vld [vmem:[%s1617_s5 + $0x70] sm:$0xff] }
 0x1a6   :  { %v1173_v21 = vpack.c.bf16 %v536_v15, %v535_v16  ;;  %v475_v22 = vadd.f32 %v474_v19, %v331_v0  ;;  %v561_v15 = vld [vmem:[%s1617_s5 + $0x60] sm:$0xff]  ;;  %v562_v16 = vld [vmem:[%s1617_s5 + $0x68] sm:$0xff]  ;;  %v584_v19 = vpop.permute.xlu0 %583 }
 0x1a7   :  { %v538_v24 = vmax.f32 %v480_v18, 0.0  ;;  %v564_v18 = vld [vmem:[%s1617_s5 + $0x78] sm:$0xff] }
 0x1a8   :  { %v537_v25 = vmax.f32 %v475_v22, 0.0  ;;  %v1068_v26 = vpop.f32.mrb[6].mxu0  ;;  %1174 = vmatprep.subr.bf16.mxu1 %v1173_v21 }
 0x1a9   :  { %v490_v27 = vadd.f32 %v1068_v26, %v346_v7  ;;  %v484_v28 = vpop.f32.mrb[7].mxu0  ;;  %1176 = vmatpush3.bf16.msra.mxu1 %v1173_v21  ;;  %v553_v7 = vld [vmem:[%s1617_s5 + $0x20] sm:$0xff] }
 0x1aa   :  { %v1177_v29 = vpack.c.bf16 %v538_v24, %v537_v25  ;;  %v485_v30 = vadd.f32 %v484_v28, %v341_v10  ;;  %v556_v10 = vld [vmem:[%s1617_s5 + $0x38] sm:$0xff]  ;;  %v594_v21 = vpop.permute.xlu0 %593 }
 0x1ab   :  { %v540_v31 = vmax.f32 %v490_v27, 0.0 }
 0x1ac   :  { %v539_v33 = vmax.f32 %v485_v30, 0.0  ;;  %v1071_v34 = vpop.f32.mrb[8].mxu0  ;;  %1178 = vmatprep.subr.bf16.mxu1 %v1177_v29 }
 0x1ad   :  { %v500_v36 = vadd.f32 %v1071_v34, %v356_v20  ;;  %v494_v37 = vpop.f32.mrb[9].mxu0  ;;  %1180 = vmatpush3.bf16.msra.mxu1 %v1177_v29  ;;  %v589_v20 = vpop.permute.xlu1 %588 }
 0x1ae   :  { %v1181_v38 = vpack.c.bf16 %v540_v31, %v539_v33  ;;  %v495_v39 = vadd.f32 %v494_v37, %v351_v23  ;;  %v604_v23 = vpop.permute.xlu0 %603 }
 0x1af   :  { %v542_v40 = vmax.f32 %v500_v36, 0.0 }
 0x1b0   :  { %v541_v41 = vmax.f32 %v495_v39, 0.0  ;;  %v1074_v42 = vpop.f32.mrb[10].mxu0  ;;  %1182 = vmatprep.subr.bf16.mxu1 %v1181_v38 }
 0x1b1   :  { %v510_v43 = vadd.f32 %v1074_v42, %v366_v32  ;;  %v504_v44 = vpop.f32.mrb[11].mxu0  ;;  %1184 = vmatpush3.bf16.msra.mxu1 %v1181_v38  ;;  %v599_v22 = vpop.permute.xlu1 %598 }
 0x1b2   :  { %v1185_v2 = vpack.c.bf16 %v542_v40, %v541_v41  ;;  %v505_v46 = vadd.f32 %v504_v44, %v361_v35  ;;  %v846_v25 = vpop.permute.xlu0 %845 }
 0x1b3   :  { %v544_v48 = vmax.f32 %v510_v43, 0.0 }
 0x1b4   :  { %v543_v49 = vmax.f32 %v505_v46, 0.0  ;;  %v1077_v50 = vpop.f32.mrb[12].mxu0  ;;  %1186 = vmatprep.subr.bf16.mxu1 %v1185_v2 }
 0x1b5   :  { %v520_v51 = vadd.f32 %v1077_v50, %v376_v45  ;;  %v514_v52 = vpop.f32.mrb[13].mxu0  ;;  %1188 = vmatpush3.bf16.msra.mxu1 %v1185_v2  ;;  %v841_v24 = vpop.permute.xlu1 %840 }
 0x1b6   :  { %v1189_v53 = vpack.c.bf16 %v544_v48, %v543_v49  ;;  %v515_v54 = vadd.f32 %v514_v52, %v371_v47  ;;  %v609_v27 = vpop.permute.xlu0 %608 }
 0x1b7   :  { %v546_v55 = vmax.f32 %v520_v51, 0.0 }
 0x1b8   :  { %v545_v57 = vmax.f32 %v515_v54, 0.0  ;;  %v1080_v58 = vpop.f32.mrb[14].mxu0  ;;  %1190 = vmatprep.subr.bf16.mxu1 %v1189_v53 }
 0x1b9   :  { %v530_v60 = vadd.f32 %v1080_v58, %v386_v56  ;;  %v524_v61 = vpop.f32.mrb[15].mxu0  ;;  %1192 = vmatpush3.bf16.msra.mxu1 %v1189_v53  ;;  %v851_v26 = vpop.permute.xlu1 %850 }
 0x1ba   :  { %v1193_v62 = vpack.c.bf16 %v546_v55, %v545_v57  ;;  %v525_v63 = vadd.f32 %v524_v61, %v381_v59  ;;  %v614_v29 = vpop.permute.xlu0 %613 }
 0x1bb   :  { %v548_v0 = vmax.f32 %v530_v60, 0.0 }
 0x1bc   :  { %v547_v1 = vmax.f32 %v525_v63, 0.0  ;;  %1194 = vmatprep.subr.bf16.mxu1 %v1193_v62 }
 0x1bd   :  { %1196 = vmatpush3.bf16.msra.mxu1 %v1193_v62  ;;  %v856_v28 = vpop.permute.xlu1 %855 }
 0x1be   :  { %v1197_v3 = vpack.c.bf16 %v548_v0, %v547_v1  ;;  %v619_v31 = vpop.permute.xlu0 %618 }
 0x1c0   :  { %1198 = vmatprep.subr.bf16.mxu1 %v1197_v3 }
 0x1c1   :  { %1200 = vmatpush3.bf16.msra.mxu1 %v1197_v3  ;;  %v861_v30 = vpop.permute.xlu1 %860 }
 0x1c2   :  { %v624_v33 = vpop.permute.xlu0 %623 }
 0x1c4   :  { %1114 = vmatmul.mubr.f32.vlgmr.msra.gmra.mrb[0].mxu1 %v550_v4 }
 0x1c5   :  { %1116 = vmatprep.mubr.f32.mxu1 %v551_v5  ;;  %v866_v32 = vpop.permute.xlu1 %865 }
 0x1c6   :  { %v629_v35 = vpop.permute.xlu0 %628 }
 0x1c8   :  { %1117 = vmatmul.mubr.f32.gmra.mrb[2].mxu1 %v552_v6 }
 0x1c9   :  { %1119 = vmatprep.mubr.f32.mxu1 %v553_v7  ;;  %v871_v34 = vpop.permute.xlu1 %870 }
 0x1ca   :  { %v634_v37 = vpop.permute.xlu0 %633 }
 0x1cc   :  { %1120 = vmatmul.mubr.f32.gmra.mrb[4].mxu1 %v554_v8 }
 0x1cd   :  { %1122 = vmatprep.mubr.f32.mxu1 %v555_v9  ;;  %v876_v36 = vpop.permute.xlu1 %875 }
 0x1ce   :  { %v639_v43 = vpop.permute.xlu0 %638 }
 0x1d0   :  { %1123 = vmatmul.mubr.f32.gmra.mrb[6].mxu1 %v556_v10 }
 0x1d1   :  { %1125 = vmatprep.mubr.f32.mxu1 %v557_v11  ;;  %v881_v38 = vpop.permute.xlu1 %880 }
 0x1d2   :  { %v644_v56 = vpop.permute.xlu0 %643 }
 0x1d4   :  { %1126 = vmatmul.mubr.f32.gmra.mrb[8].mxu1 %v558_v12 }
 0x1d5   :  { %1128 = vmatprep.mubr.f32.mxu1 %v559_v13  ;;  %v886_v46 = vpop.permute.xlu1 %885 }
 0x1d6   :  { %v649_v9 = vpop.permute.xlu0 %648 }
 0x1d8   :  { %1129 = vmatmul.mubr.f32.gmra.mrb[10].mxu1 %v560_v14 }
 0x1d9   :  { %1131 = vmatprep.mubr.f32.mxu1 %v561_v15  ;;  %v891_v61 = vpop.permute.xlu1 %890 }
 0x1dc   :  { %1132 = vmatmul.mubr.f32.gmra.mrb[12].mxu1 %v562_v16 }
 0x1dd   :  { %1134 = vmatprep.mubr.f32.mxu1 %v563_v17  ;;  %v896_v15 = vpop.permute.xlu1 %895 }
 0x1e0   :  { %1135 = vmatmul.mubr.f32.gmra.mrb[14].mxu1 %v564_v18 }
 0x297   :  { %v1115_v39 = vpop.f32.mrb[0].mxu1 }
 0x298   :  { %v733_v40 = vadd.f32 %v1115_v39, %v589_v20  ;;  %v727_v41 = vpop.f32.mrb[1].mxu1 }
 0x299   :  { %v728_v42 = vadd.f32 %v727_v41, %v584_v19 }
 0x29a   :  { %v807_v44 = vmax.f32 %v733_v40, 0.0 }
 0x29b   :  { %v806_v45 = vmax.f32 %v728_v42, 0.0  ;;  %v1118_v2 = vpop.f32.mrb[2].mxu1 }
 0x29c   :  { %v919_v47 = vmul.f32 %v846_v25, %v807_v44  ;;  %v743_v48 = vadd.f32 %v1118_v2, %v599_v22  ;;  %v737_v49 = vpop.f32.mrb[3].mxu1 }
 0x29d   :  { %v918_v50 = vmul.f32 %v841_v24, %v806_v45  ;;  %v738_v51 = vadd.f32 %v737_v49, %v594_v21 }
 0x29e   :  { %v809_v53 = vmax.f32 %v743_v48, 0.0 }
 0x29f   :  { %v934_v52 = vadd.f32 %v919_v47, %v918_v50  ;;  %v808_v54 = vmax.f32 %v738_v51, 0.0  ;;  %v1121_v55 = vpop.f32.mrb[4].mxu1 }
 0x2a0   :  { %v753_v57 = vadd.f32 %v1121_v55, %v609_v27  ;;  %v747_v58 = vpop.f32.mrb[5].mxu1  ;;  %v921_v62 = vmul.f32 %v856_v28, %v809_v53 }
 0x2a1   :  { %v920_v59 = vmul.f32 %v851_v26, %v808_v54  ;;  %v748_v60 = vadd.f32 %v747_v58, %v604_v23  ;;  %v654_v26 = vpop.permute.xlu0 %653 }
 0x2a2   :  { %v811_v0 = vmax.f32 %v753_v57, 0.0 }
 0x2a3   :  { %v935_v63 = vadd.f32 %v934_v52, %v920_v59  ;;  %v810_v1 = vmax.f32 %v748_v60, 0.0  ;;  %v1124_v3 = vpop.f32.mrb[6].mxu1 }
 0x2a4   :  { %v763_v4 = vadd.f32 %v1124_v3, %v619_v31  ;;  %v757_v5 = vpop.f32.mrb[7].mxu1  ;;  %v923_v10 = vmul.f32 %v866_v32, %v811_v0  ;;  %v901_v32 = vpop.permute.xlu1 %900 }
 0x2a5   :  { %v922_v6 = vmul.f32 %v861_v30, %v810_v1  ;;  %v936_v7 = vadd.f32 %v935_v63, %v921_v62  ;;  %v758_v8 = vadd.f32 %v757_v5, %v614_v29  ;;  %v659_v2 = vpop.permute.xlu0 %658 }
 0x2a6   :  { %v813_v12 = vmax.f32 %v763_v4, 0.0 }
 0x2a7   :  { %v937_v11 = vadd.f32 %v936_v7, %v922_v6  ;;  %v812_v13 = vmax.f32 %v758_v8, 0.0  ;;  %v1127_v14 = vpop.f32.mrb[8].mxu1 }
 0x2a8   :  { %v773_v16 = vadd.f32 %v1127_v14, %v629_v35  ;;  %v767_v17 = vpop.f32.mrb[9].mxu1  ;;  %v925_v21 = vmul.f32 %v876_v36, %v813_v12 }
 0x2a9   :  { %v924_v18 = vmul.f32 %v871_v34, %v812_v13  ;;  %v938_v19 = vadd.f32 %v937_v11, %v923_v10  ;;  %v768_v20 = vadd.f32 %v767_v17, %v624_v33  ;;  %v911_v59 = vpop.permute.xlu0 %910 }
 0x2aa   :  { %v815_v23 = vmax.f32 %v773_v16, 0.0 }
 0x2ab   :  { %v939_v22 = vadd.f32 %v938_v19, %v924_v18  ;;  %v814_v24 = vmax.f32 %v768_v20, 0.0  ;;  %v1130_v25 = vpop.f32.mrb[10].mxu1 }
 0x2ac   :  { %v783_v27 = vadd.f32 %v1130_v25, %v639_v43  ;;  %v777_v28 = vpop.f32.mrb[11].mxu1  ;;  %v927_v39 = vmul.f32 %v886_v46, %v815_v23 }
 0x2ad   :  { %v926_v29 = vmul.f32 %v881_v38, %v814_v24  ;;  %v940_v30 = vadd.f32 %v939_v22, %v925_v21  ;;  %v778_v31 = vadd.f32 %v777_v28, %v634_v37  ;;  %v906_v38 = vpop.permute.xlu1 %905 }
 0x2ae   :  { %v817_v41 = vmax.f32 %v783_v27, 0.0 }
 0x2af   :  { %v941_v40 = vadd.f32 %v940_v30, %v926_v29  ;;  %v816_v35 = vmax.f32 %v778_v31, 0.0  ;;  %v1133_v42 = vpop.f32.mrb[12].mxu1 }
 0x2b0   :  { %v793_v34 = vadd.f32 %v1133_v42, %v649_v9  ;;  %v787_v44 = vpop.f32.mrb[13].mxu1  ;;  %v929_v47 = vmul.f32 %v896_v15, %v817_v41 }
 0x2b1   :  { %v928_v33 = vmul.f32 %v891_v61, %v816_v35  ;;  %v942_v36 = vadd.f32 %v941_v40, %v927_v39  ;;  %v788_v45 = vadd.f32 %v787_v44, %v644_v56  ;;  %v916_v56 = vpop.permute.xlu1 %915 }
 0x2b2   :  { %v819_v49 = vmax.f32 %v793_v34, 0.0 }
 0x2b3   :  { %v943_v48 = vadd.f32 %v942_v36, %v928_v33  ;;  %v818_v43 = vmax.f32 %v788_v45, 0.0  ;;  %v1136_v50 = vpop.f32.mrb[14].mxu1 }
 0x2b4   :  { %v803_v51 = vadd.f32 %v1136_v50, %v659_v2  ;;  %v797_v37 = vpop.f32.mrb[15].mxu1  ;;  %v931_v54 = vmul.f32 %v906_v38, %v819_v49 }
 0x2b5   :  { %v930_v52 = vmul.f32 %v901_v32, %v818_v43  ;;  %v944_v46 = vadd.f32 %v943_v48, %v929_v47  ;;  %v798_v53 = vadd.f32 %v797_v37, %v654_v26 }
 0x2b6   :  { %v821_v57 = vmax.f32 %v803_v51, 0.0 }
 0x2b7   :  { %v945_v55 = vadd.f32 %v944_v46, %v930_v52  ;;  %v820_v58 = vmax.f32 %v798_v53, 0.0 }
 0x2b8   :  { %v933_v62 = vmul.f32 %v916_v56, %v821_v57 }
 0x2b9   :  { %v932_v60 = vmul.f32 %v911_v59, %v820_v58  ;;  %v946_v61 = vadd.f32 %v945_v55, %v931_v54 }
 0x2bb   :  { %v947_v63 = vadd.f32 %v946_v61, %v932_v60 }
 0x2bd   :  { %v948_v0 = vadd.f32 %v947_v63, %v933_v62 }
 0x2bf   :  { %v949_v1 = vrot.slane %v948_v0, 4 }
 0x2c1   :  { %v950_v3 = vadd.f32 %v949_v1, %v948_v0 }
 0x2c3   :  { %v951_v4 = vrot.slane %v950_v3, 2 }
 0x2c5   :  { %v952_v5 = vadd.f32 %v951_v4, %v950_v3 }
 0x2c7   :  { %v953_v6 = vrot.slane %v952_v5, 1 }
 0x2c9   :  { %v954_v7 = vadd.f32 %v953_v6, %v952_v5 }
 0x2cb   :  { %955 = vst [vmem:[%s1618_s8] sm:$0x1] %v954_v7 }

</bundles_post_ra>
